<compile_context>
chip_gen: v7x
topology: tpu7x:2x2x1
jax: 0.10.0
libtpu: 0.0.40
codegen_flags: <defaults>
</compile_context>

<pallas_src>
import jax
import jax.numpy as jnp
from jax.experimental import pallas as pl
from jax.experimental.pallas import tpu as pltpu

HIDDEN = (128, 256, 128)
LANE = 128
SUBLANE = 8
# Per-grid-step VMEM budget (keeps headroom under v7x's 64 MiB physical VMEM).
VMEM_BUDGET = 40 * 1024 * 1024


def _round_up(x, m):
    return ((x + m - 1) // m) * m


def dqn_mlp_kernel(x_ref,
                   w1_ref, b1_ref,
                   w2_ref, b2_ref,
                   w3_ref, b3_ref,
                   w4_ref, b4_ref,
                   out_ref):
    # bf16 operands into the MXU, f32 accumulation, f32 bias add + ReLU.
    # Layer 1: Linear(input_dim, 128) + ReLU
    h = jnp.dot(x_ref[...].astype(jnp.bfloat16), w1_ref[...],
                preferred_element_type=jnp.float32)
    h = jnp.maximum(h + b1_ref[...], 0.0)
    # Layer 2: Linear(128, 256) + ReLU
    h = jnp.dot(h.astype(jnp.bfloat16), w2_ref[...],
                preferred_element_type=jnp.float32)
    h = jnp.maximum(h + b2_ref[...], 0.0)
    # Layer 3: Linear(256, 128) + ReLU
    h = jnp.dot(h.astype(jnp.bfloat16), w3_ref[...],
                preferred_element_type=jnp.float32)
    h = jnp.maximum(h + b3_ref[...], 0.0)
    # Layer 4: Linear(128, out_pad) (no activation; padded cols are zero)
    h = jnp.dot(h.astype(jnp.bfloat16), w4_ref[...],
                preferred_element_type=jnp.float32)
    out_ref[...] = (h + b4_ref[...]).astype(out_ref.dtype)


def dqn_forward(x, params, *, batch_tile=1024):
    """Run the DQN MLP forward pass as a batch-tiled Pallas kernel.

    x: (B, input_dim) float32
    params: dict from init_params (w1..w4 bf16 as (in, out) = W_pt.T,
            b1..b4 f32 as (1, out), w4/b4 zero-padded to a lane-aligned width,
            plus "out_dim").
    """
    B, in_dim = x.shape
    out_dim = params["out_dim"]
    out_pad = params["w4"].shape[1]

    weight_args = (params["w1"], params["b1"],
                   params["w2"], params["b2"],
                   params["w3"], params["b3"],
                   params["w4"], params["b4"])

    # ---- batch-tile selection ------------------------------------------------
    # multiple of 8; >= 2 grid steps when B > 8 (use both v7x TensorCores);
    # capped by the per-step VMEM budget.
    if B > SUBLANE:
        tb = min(_round_up(batch_tile, SUBLANE),
                 _round_up(pl.cdiv(B, 2), SUBLANE))
    else:
        tb = _round_up(B, SUBLANE)

    # Approximate per-row VMEM bytes: 2x-buffered x + 2x-buffered out (f32)
    # plus f32 layer intermediates and their bf16 casts.
    per_row = (2 * in_dim * 4 + 2 * out_pad * 4
               + (HIDDEN[0] + HIDDEN[1] + HIDDEN[2] + out_pad) * 4
               + (in_dim + HIDDEN[0] + HIDDEN[1] + HIDDEN[2]) * 2)
    fixed_bytes = 2 * sum(int(w.size) * w.dtype.itemsize for w in weight_args)
    max_tb = max(SUBLANE,
                 ((VMEM_BUDGET - fixed_bytes) // per_row) // SUBLANE * SUBLANE)
    tb = max(SUBLANE, min(tb, max_tb))

    grid = (pl.cdiv(B, tb),)   # ragged last block: Pallas clips reads/writes

    def tile_map(i):
        return (i, 0)

    def const_map(i):
        return (0, 0)

    # x last-dim block = full array dim (satisfies the (8,128) rule even for
    # narrow input_dim); weights/biases are single VMEM-resident blocks.
    in_specs = [pl.BlockSpec((tb, in_dim), tile_map)]
    in_specs += [pl.BlockSpec(w.shape, const_map) for w in weight_args]
    out_spec = pl.BlockSpec((tb, out_pad), tile_map)

    n_rows = grid[0] * tb
    flops = 2 * n_rows * (in_dim * HIDDEN[0] + HIDDEN[0] * HIDDEN[1]
                          + HIDDEN[1] * HIDDEN[2] + HIDDEN[2] * out_pad)
    bytes_accessed = B * (in_dim + out_pad) * 4 + fixed_bytes // 2

    footprint = fixed_bytes + tb * per_row
    vmem_limit = int(min(max(2 * footprint, 32 * 1024 * 1024),
                         48 * 1024 * 1024))

    out = pl.pallas_call(
        dqn_mlp_kernel,
        out_shape=jax.ShapeDtypeStruct((B, out_pad), jnp.float32),
        grid=grid,
        in_specs=in_specs,
        out_specs=out_spec,
        compiler_params=pltpu.CompilerParams(
            dimension_semantics=("parallel",),
            vmem_limit_bytes=vmem_limit,
        ),
        cost_estimate=pl.CostEstimate(
            flops=flops, transcendentals=0, bytes_accessed=bytes_accessed),
    )(x, *weight_args)

    return out[:, :out_dim]


def init_params(key, input_dim, output_dim):
    """PyTorch-style (Kaiming-uniform-ish) init for the 4 Linear layers.

    Weights stored bf16 as (in_features, out_features) = W_pt.T; biases f32 as
    (1, out).  The last layer is zero-padded to a lane-aligned (128x) width.
    """
    dims = [(input_dim, HIDDEN[0]), (HIDDEN[0], HIDDEN[1]),
            (HIDDEN[1], HIDDEN[2]), (HIDDEN[2], output_dim)]
    out_pad = _round_up(output_dim, LANE)
    params = {"out_dim": output_dim}
    for i, (fan_in, fan_out) in enumerate(dims, start=1):
        key, kw, kb = jax.random.split(key, 3)
        bound = float(fan_in) ** -0.5
        w = jax.random.uniform(kw, (fan_in, fan_out), jnp.float32, -bound, bound)
        b = jax.random.uniform(kb, (1, fan_out), jnp.float32, -bound, bound)
        if i == 4 and fan_out != out_pad:
            w = jnp.pad(w, ((0, 0), (0, out_pad - fan_out)))
            b = jnp.pad(b, ((0, 0), (0, out_pad - fan_out)))
        params[f"w{i}"] = w.astype(jnp.bfloat16)
        params[f"b{i}"] = b
    return params


def reference_forward(x, params):
    """Pure-JAX reference mirroring the kernel's mixed precision
    (bf16 matmul operands, f32 accumulation / bias / ReLU)."""
    out_dim = params["out_dim"]

    def lin(h, w, b):
        return jnp.dot(h.astype(jnp.bfloat16), w,
                       preferred_element_type=jnp.float32) + b

    h = jnp.maximum(lin(x, params["w1"], params["b1"]), 0.0)
    h = jnp.maximum(lin(h, params["w2"], params["b2"]), 0.0)
    h = jnp.maximum(lin(h, params["w3"], params["b3"]), 0.0)
    return lin(h, params["w4"], params["b4"])[:, :out_dim]


if __name__ == "__main__":
    key = jax.random.PRNGKey(0)
    key, kp, kx, kx2 = jax.random.split(key, 4)

    input_dim = 32   # e.g. a small state vector
    output_dim = 8   # e.g. number of discrete actions
    params = init_params(kp, input_dim, output_dim)

    # Small-batch check (single grid step, tile shrinks to the batch).
    x = jax.random.normal(kx, (8, input_dim), jnp.float32)
    out = jax.block_until_ready(dqn_forward(x, params))
    ref = reference_forward(x, params)
    assert out.shape == (8, output_dim)
    assert jnp.allclose(out, ref, atol=2e-2, rtol=2e-2)

    # Multi-tile check: grid = 2 (both v7x TCs), ragged last block (300 % 152).
    x2 = jax.random.normal(kx2, (300, input_dim), jnp.float32)
    out2 = jax.block_until_ready(dqn_forward(x2, params))
    ref2 = reference_forward(x2, params)
    assert out2.shape == (300, output_dim)
    assert jnp.allclose(out2, ref2, atol=2e-2, rtol=2e-2)

    print("KERNEL_OK")
</pallas_src>

<mosaic_0001>
module attributes {stable_mosaic.version = 11 : i64} {
  func.func @dqn_mlp_kernel(%arg0: i32, %arg1: memref<8x32xf32, #tpu.memory_space<vmem>>, %arg2: memref<32x128xbf16, #tpu.memory_space<vmem>>, %arg3: memref<1x128xf32, #tpu.memory_space<vmem>>, %arg4: memref<128x256xbf16, #tpu.memory_space<vmem>>, %arg5: memref<1x256xf32, #tpu.memory_space<vmem>>, %arg6: memref<256x128xbf16, #tpu.memory_space<vmem>>, %arg7: memref<1x128xf32, #tpu.memory_space<vmem>>, %arg8: memref<128x128xbf16, #tpu.memory_space<vmem>>, %arg9: memref<1x128xf32, #tpu.memory_space<vmem>>, %arg10: memref<8x128xf32, #tpu.memory_space<vmem>>) attributes {dimension_semantics = [#tpu.dimension_semantics<parallel>], iteration_bounds = array<i64: 1>, scalar_prefetch = 0 : i64, scratch_operands = 0 : i64, tpu.core_type = #tpu.core_type<tc>, window_params = [{transform_indices = @transform_0, window_bounds = array<i64: 8, 32>}, {pipeline_mode = #tpu.pipeline_mode<synchronous>, transform_indices = @transform_1, window_bounds = array<i64: 32, 128>}, {pipeline_mode = #tpu.pipeline_mode<synchronous>, transform_indices = @transform_2, window_bounds = array<i64: 1, 128>}, {pipeline_mode = #tpu.pipeline_mode<synchronous>, transform_indices = @transform_3, window_bounds = array<i64: 128, 256>}, {pipeline_mode = #tpu.pipeline_mode<synchronous>, transform_indices = @transform_4, window_bounds = array<i64: 1, 256>}, {pipeline_mode = #tpu.pipeline_mode<synchronous>, transform_indices = @transform_5, window_bounds = array<i64: 256, 128>}, {pipeline_mode = #tpu.pipeline_mode<synchronous>, transform_indices = @transform_6, window_bounds = array<i64: 1, 128>}, {pipeline_mode = #tpu.pipeline_mode<synchronous>, transform_indices = @transform_7, window_bounds = array<i64: 128, 128>}, {pipeline_mode = #tpu.pipeline_mode<synchronous>, transform_indices = @transform_8, window_bounds = array<i64: 1, 128>}, {transform_indices = @transform_9, window_bounds = array<i64: 8, 128>}]} {
    %c0 = arith.constant 0 : index
    %c0_0 = arith.constant 0 : index
    %0 = vector.load %arg1[%c0, %c0_0] : memref<8x32xf32, #tpu.memory_space<vmem>>, vector<8x32xf32>
    %1 = arith.truncf %0 : vector<8x32xf32> to vector<8x32xbf16>
    %c0_1 = arith.constant 0 : index
    %c0_2 = arith.constant 0 : index
    %2 = vector.load %arg2[%c0_1, %c0_2] : memref<32x128xbf16, #tpu.memory_space<vmem>>, vector<32x128xbf16>
    %cst = arith.constant dense<0.000000e+00> : vector<8x128xf32>
    %3 = tpu.matmul %1, %2, %cst {dimension_numbers = #tpu.dot_dimension_numbers<[1], [0], [0], [1], [0, 0, 1, 1], [], []>} : vector<8x32xbf16>, vector<32x128xbf16>, vector<8x128xf32> -> vector<8x128xf32>
    %c0_3 = arith.constant 0 : index
    %c0_4 = arith.constant 0 : index
    %4 = vector.load %arg3[%c0_3, %c0_4] : memref<1x128xf32, #tpu.memory_space<vmem>>, vector<1x128xf32>
    %5 = vector.broadcast %4 : vector<1x128xf32> to vector<8x128xf32>
    %6 = arith.addf %3, %5 : vector<8x128xf32>
    %cst_5 = arith.constant 0.000000e+00 : f32
    %7 = vector.broadcast %cst_5 : f32 to vector<8x128xf32>
    %8 = arith.maximumf %6, %7 : vector<8x128xf32>
    %9 = arith.truncf %8 : vector<8x128xf32> to vector<8x128xbf16>
    %c0_6 = arith.constant 0 : index
    %c0_7 = arith.constant 0 : index
    %10 = vector.load %arg4[%c0_6, %c0_7] : memref<128x256xbf16, #tpu.memory_space<vmem>>, vector<128x256xbf16>
    %cst_8 = arith.constant dense<0.000000e+00> : vector<8x256xf32>
    %11 = tpu.matmul %9, %10, %cst_8 {dimension_numbers = #tpu.dot_dimension_numbers<[1], [0], [0], [1], [0, 0, 1, 1], [], []>} : vector<8x128xbf16>, vector<128x256xbf16>, vector<8x256xf32> -> vector<8x256xf32>
    %c0_9 = arith.constant 0 : index
    %c0_10 = arith.constant 0 : index
    %12 = vector.load %arg5[%c0_9, %c0_10] : memref<1x256xf32, #tpu.memory_space<vmem>>, vector<1x256xf32>
    %13 = vector.broadcast %12 : vector<1x256xf32> to vector<8x256xf32>
    %14 = arith.addf %11, %13 : vector<8x256xf32>
    %cst_11 = arith.constant 0.000000e+00 : f32
    %15 = vector.broadcast %cst_11 : f32 to vector<8x256xf32>
    %16 = arith.maximumf %14, %15 : vector<8x256xf32>
    %17 = arith.truncf %16 : vector<8x256xf32> to vector<8x256xbf16>
    %c0_12 = arith.constant 0 : index
    %c0_13 = arith.constant 0 : index
    %18 = vector.load %arg6[%c0_12, %c0_13] : memref<256x128xbf16, #tpu.memory_space<vmem>>, vector<256x128xbf16>
    %cst_14 = arith.constant dense<0.000000e+00> : vector<8x128xf32>
    %19 = tpu.matmul %17, %18, %cst_14 {dimension_numbers = #tpu.dot_dimension_numbers<[1], [0], [0], [1], [0, 0, 1, 1], [], []>} : vector<8x256xbf16>, vector<256x128xbf16>, vector<8x128xf32> -> vector<8x128xf32>
    %c0_15 = arith.constant 0 : index
    %c0_16 = arith.constant 0 : index
    %20 = vector.load %arg7[%c0_15, %c0_16] : memref<1x128xf32, #tpu.memory_space<vmem>>, vector<1x128xf32>
    %21 = vector.broadcast %20 : vector<1x128xf32> to vector<8x128xf32>
    %22 = arith.addf %19, %21 : vector<8x128xf32>
    %cst_17 = arith.constant 0.000000e+00 : f32
    %23 = vector.broadcast %cst_17 : f32 to vector<8x128xf32>
    %24 = arith.maximumf %22, %23 : vector<8x128xf32>
    %25 = arith.truncf %24 : vector<8x128xf32> to vector<8x128xbf16>
    %c0_18 = arith.constant 0 : index
    %c0_19 = arith.constant 0 : index
    %26 = vector.load %arg8[%c0_18, %c0_19] : memref<128x128xbf16, #tpu.memory_space<vmem>>, vector<128x128xbf16>
    %cst_20 = arith.constant dense<0.000000e+00> : vector<8x128xf32>
    %27 = tpu.matmul %25, %26, %cst_20 {dimension_numbers = #tpu.dot_dimension_numbers<[1], [0], [0], [1], [0, 0, 1, 1], [], []>} : vector<8x128xbf16>, vector<128x128xbf16>, vector<8x128xf32> -> vector<8x128xf32>
    %c0_21 = arith.constant 0 : index
    %c0_22 = arith.constant 0 : index
    %28 = vector.load %arg9[%c0_21, %c0_22] : memref<1x128xf32, #tpu.memory_space<vmem>>, vector<1x128xf32>
    %29 = vector.broadcast %28 : vector<1x128xf32> to vector<8x128xf32>
    %30 = arith.addf %27, %29 : vector<8x128xf32>
    %c0_23 = arith.constant 0 : index
    %c0_24 = arith.constant 0 : index
    %31 = vector.load %arg10[%c0_23, %c0_24] : memref<8x128xf32, #tpu.memory_space<vmem>>, vector<8x128xf32>
    tpu.vector_store %arg10[%c0_23, %c0_24], %30 {strides = array<i32>} : memref<8x128xf32, #tpu.memory_space<vmem>>, vector<8x128xf32>,
    return
  }
  func.func @transform_0(%arg0: i32) -> (i32, i32) {
    %c0_i32 = arith.constant 0 : i32
    %c0_i32_0 = arith.constant 0 : i32
    return %arg0, %c0_i32 : i32, i32
  }
  func.func @transform_1(%arg0: i32) -> (i32, i32) {
    %c0_i32 = arith.constant 0 : i32
    %c0_i32_0 = arith.constant 0 : i32
    %c0_i32_1 = arith.constant 0 : i32
    return %c0_i32, %c0_i32_0 : i32, i32
  }
  func.func @transform_2(%arg0: i32) -> (i32, i32) {
    %c0_i32 = arith.constant 0 : i32
    %c0_i32_0 = arith.constant 0 : i32
    %c0_i32_1 = arith.constant 0 : i32
    return %c0_i32, %c0_i32_0 : i32, i32
  }
  func.func @transform_3(%arg0: i32) -> (i32, i32) {
    %c0_i32 = arith.constant 0 : i32
    %c0_i32_0 = arith.constant 0 : i32
    %c0_i32_1 = arith.constant 0 : i32
    return %c0_i32, %c0_i32_0 : i32, i32
  }
  func.func @transform_4(%arg0: i32) -> (i32, i32) {
    %c0_i32 = arith.constant 0 : i32
    %c0_i32_0 = arith.constant 0 : i32
    %c0_i32_1 = arith.constant 0 : i32
    return %c0_i32, %c0_i32_0 : i32, i32
  }
  func.func @transform_5(%arg0: i32) -> (i32, i32) {
    %c0_i32 = arith.constant 0 : i32
    %c0_i32_0 = arith.constant 0 : i32
    %c0_i32_1 = arith.constant 0 : i32
    return %c0_i32, %c0_i32_0 : i32, i32
  }
  func.func @transform_6(%arg0: i32) -> (i32, i32) {
    %c0_i32 = arith.constant 0 : i32
    %c0_i32_0 = arith.constant 0 : i32
    %c0_i32_1 = arith.constant 0 : i32
    return %c0_i32, %c0_i32_0 : i32, i32
  }
  func.func @transform_7(%arg0: i32) -> (i32, i32) {
    %c0_i32 = arith.constant 0 : i32
    %c0_i32_0 = arith.constant 0 : i32
    %c0_i32_1 = arith.constant 0 : i32
    return %c0_i32, %c0_i32_0 : i32, i32
  }
  func.func @transform_8(%arg0: i32) -> (i32, i32) {
    %c0_i32 = arith.constant 0 : i32
    %c0_i32_0 = arith.constant 0 : i32
    %c0_i32_1 = arith.constant 0 : i32
    return %c0_i32, %c0_i32_0 : i32, i32
  }
  func.func @transform_9(%arg0: i32) -> (i32, i32) {
    %c0_i32 = arith.constant 0 : i32
    %c0_i32_0 = arith.constant 0 : i32
    return %arg0, %c0_i32 : i32, i32
  }
}

</mosaic_0001>

<bundles_post_ra>
// kernel: tpu_custom_call.1
= control target key start
LH: loop header
LB: loop body
LE: loop exit
PB: predicated region body
PF: predicated region fallthrough
CT: control target
= control target key end

     0   :  { %14 = vsyncpa [#allocation3], 0  ;;  %s1111_s0 = inlined_call_operand.hbm [shape: f32[8,32], index: 0, kind: input, shape index: {}]   ;;  %s1112_s1 = inlined_call_operand.hbm [shape: bf16[32,128], index: 1, kind: input, shape index: {}]   ;;  %s1113_s2 = inlined_call_operand.vmem [shape: f32[1,128], index: 2, kind: input, shape index: {}]   ;;  %s1114_s3 = inlined_call_operand.hbm [shape: bf16[128,256], index: 3, kind: input, shape index: {}]   ;;  %s1115_s4 = inlined_call_operand.vmem [shape: f32[1,256], index: 4, kind: input, shape index: {}]   ;;  %s1116_s5 = inlined_call_operand.hbm [shape: bf16[256,128], index: 5, kind: input, shape index: {}]   ;;  %s1117_s6 = inlined_call_operand.vmem [shape: f32[1,128], index: 6, kind: input, shape index: {}]   ;;  %s1118_s7 = inlined_call_operand.hbm [shape: bf16[128,128], index: 7, kind: input, shape index: {}]   ;;  %s1119_s8 = inlined_call_operand.vmem [shape: f32[1,128], index: 8, kind: input, shape index: {}]   ;;  %s1120_s9 = inlined_call_operand.hbm [shape: f32[8,128], index: 9, kind: output, shape index: {}]  }
   0x1   :  { %15 = vsyncpa [#allocation6], 0 }
   0x2   :  { %16 = vsyncpa [#allocation9], 0 }
   0x3   :  { %17 = vsyncpa [#allocation4], 0  ;;  %s941_s30 = smov [#allocation5]   ;;  %s801_s13 = scalar_lea.hbm %s1112_s1, 256 }
   0x4   :  { %s33_s10 = sshll.u32 %s941_s30, 4  ;;  %p802_p0 = scmp.ne.s32.totalorder %s1112_s1, %s801_s13  ;;  %s34_s10 = int_to_ptr.vmem [resolvable:$true] %s33_s10 }
   0x5   :  { %p805_p1 = scmp.lt.u32.totalorder %s801_s13, %s1112_s1 }
   0x7   :  { %p807_p2 = pnand %p805_p1, %p802_p0 }
   0x9   :  { %810 = shalt.err (!%p807_p2)
}
   0xa   :  { %s811_s18 = scalar_lea.vmem %s34_s10, 256  ;;  %p816_p4 = scmp.lt.s32.totalorder %s34_s10, %s34_s10 }
   0xb   :  { %p812_p3 = scmp.ne.s32.totalorder %s34_s10, %s811_s18  ;;  %p817_p5 = scmp.lt.s32.totalorder %s811_s18, %s811_s18 }
   0xd   :  { %p818_p6 = por %p817_p5, %p816_p4 }
   0xf   :  { %p819_p7 = pnand %p818_p6, %p812_p3 }
  0x11   :  { %822 = shalt.err (!%p819_p7)
}
  0x12   :  { %s942_s19 = smov 64   ;;  %s943_s20 = smov 4  }
  0x13   :  { %39 = dma.hbm_to_vmem [thread:$0]  %s1112_s1, 256, %s34_s10, [#allocation6], %s942_s19, %s942_s19, %s943_s20  }
  0x14   :  { %s944_s23 = smov [#allocation8]   ;;  %s945_s25 = smov [#allocation2]  }
  0x15   :  { %s61_s24 = sshll.u32 %s944_s23, 4  ;;  %s24_s26 = sshll.u32 %s945_s25, 4  ;;  %s62_s24 = int_to_ptr.vmem [resolvable:$true] %s61_s24  ;;  %s25_s26 = int_to_ptr.vmem [resolvable:$true] %s24_s26 }
  0x16   :  { %s823_s29 = scalar_lea.hbm %s1116_s5, 2048 }
  0x17   :  { %p824_p8 = scmp.ne.s32.totalorder %s1116_s5, %s823_s29  ;;  %p827_p9 = scmp.lt.u32.totalorder %s823_s29, %s1116_s5 }
  0x19   :  { %p829_p10 = pnand %p827_p9, %p824_p8 }
  0x1b   :  { %832 = shalt.err (!%p829_p10)
}
  0x1c   :  { %s833_s1 = scalar_lea.vmem %s62_s24, 2048  ;;  %p838_p12 = scmp.lt.s32.totalorder %s62_s24, %s62_s24 }
  0x1d   :  { %p834_p11 = scmp.ne.s32.totalorder %s62_s24, %s833_s1  ;;  %p839_p13 = scmp.lt.s32.totalorder %s833_s1, %s833_s1 }
  0x1f   :  { %p840_p0 = por %p839_p13, %p838_p12 }
  0x21   :  { %p841_p1 = pnand %p840_p0, %p834_p11 }
  0x23   :  { %844 = shalt.err (!%p841_p1)
}
  0x24   :  { %67 = dma.hbm_to_vmem [thread:$0]  %s1116_s5, 2048, %s62_s24, [#allocation9], %s942_s19, %s942_s19, %s943_s20  }
  0x25   :  { %s845_s17 = scalar_lea.hbm %s1111_s0, 128 }
  0x26   :  { %p846_p2 = scmp.ne.s32.totalorder %s1111_s0, %s845_s17  ;;  %p849_p3 = scmp.lt.u32.totalorder %s845_s17, %s1111_s0 }
  0x28   :  { %p851_p4 = pnand %p849_p3, %p846_p2 }
  0x2a   :  { %854 = shalt.err (!%p851_p4)
}
  0x2b   :  { %s855_s25 = scalar_lea.vmem %s25_s26, 128  ;;  %p860_p6 = scmp.lt.s32.totalorder %s25_s26, %s25_s26 }
  0x2c   :  { %p856_p5 = scmp.ne.s32.totalorder %s25_s26, %s855_s25  ;;  %p861_p7 = scmp.lt.s32.totalorder %s855_s25, %s855_s25 }
  0x2e   :  { %p862_p8 = por %p861_p7, %p860_p6 }
  0x30   :  { %p863_p9 = pnand %p862_p8, %p856_p5 }
  0x32   :  { %866 = shalt.err (!%p863_p9)
}
  0x33   :  { %27 = dma.hbm_to_vmem [thread:$0]  %s1111_s0, 128, %s25_s26, [#allocation3]  }
  0x34   :  { %s946_s27 = smov [#allocation7]   ;;  %s867_s11 = scalar_lea.hbm %s1114_s3, 2048 }
  0x35   :  { %s47_s28 = sshll.u32 %s946_s27, 4  ;;  %p868_p10 = scmp.ne.s32.totalorder %s1114_s3, %s867_s11  ;;  %s48_s28 = int_to_ptr.vmem [resolvable:$true] %s47_s28 }
  0x36   :  { %p871_p11 = scmp.lt.u32.totalorder %s867_s11, %s1114_s3 }
  0x38   :  { %p873_p12 = pnand %p871_p11, %p868_p10 }
  0x3a   :  { %876 = shalt.err (!%p873_p12)
}
  0x3b   :  { %s877_s14 = scalar_lea.vmem %s48_s28, 2048  ;;  %p882_p0 = scmp.lt.s32.totalorder %s48_s28, %s48_s28 }
  0x3c   :  { %p878_p13 = scmp.ne.s32.totalorder %s48_s28, %s877_s14  ;;  %p883_p1 = scmp.lt.s32.totalorder %s877_s14, %s877_s14 }
  0x3e   :  { %p884_p2 = por %p883_p1, %p882_p0 }
  0x40   :  { %p885_p3 = pnand %p884_p2, %p878_p13 }
  0x42   :  { %888 = shalt.err (!%p885_p3)
}
  0x43   :  { %s947_s0 = smov 128   ;;  %s948_s26 = smov 8  }
  0x44   :  { %53 = dma.hbm_to_vmem [thread:$0]  %s1114_s3, 2048, %s48_s28, [#allocation6], %s947_s0, %s947_s0, %s948_s26  }
  0x45   :  { %s949_s17 = smov [#allocation10]   ;;  %s889_s23 = scalar_lea.hbm %s1118_s7, 1024 }
  0x46   :  { %s75_s18 = sshll.u32 %s949_s17, 4  ;;  %p890_p4 = scmp.ne.s32.totalorder %s1118_s7, %s889_s23  ;;  %s76_s18 = int_to_ptr.vmem [resolvable:$true] %s75_s18 }
  0x47   :  { %p893_p5 = scmp.lt.u32.totalorder %s889_s23, %s1118_s7 }
  0x49   :  { %p895_p6 = pnand %p893_p5, %p890_p4 }
  0x4b   :  { %898 = shalt.err (!%p895_p6)
}
  0x4c   :  { %s899_s29 = scalar_lea.vmem %s76_s18, 1024  ;;  %p904_p8 = scmp.lt.s32.totalorder %s76_s18, %s76_s18 }
  0x4d   :  { %p900_p7 = scmp.ne.s32.totalorder %s76_s18, %s899_s29  ;;  %p905_p9 = scmp.lt.s32.totalorder %s899_s29, %s899_s29 }
  0x4f   :  { %p906_p10 = por %p905_p9, %p904_p8 }
  0x51   :  { %p907_p11 = pnand %p906_p10, %p900_p7 }
  0x53   :  { %910 = shalt.err (!%p907_p11)
}
  0x54   :  { %81 = dma.hbm_to_vmem [thread:$0]  %s1118_s7, 1024, %s76_s18, [#allocation9], %s942_s19, %s942_s19, %s943_s20  }
  0x55   :  { %933 = dma.done.wait [#allocation3], 128  }
  0x56   :  { %934 = vsyncadd [#allocation3], 4294967168 }
  0x57   :  { %935 = dma.done.wait [#allocation6], 2304  }
  0x58   :  { %936 = vsyncadd [#allocation6], 4294964992 }
  0x59   :  { %937 = dma.done.wait [#allocation9], 3072  }
  0x5a   :  { %938 = vsyncadd [#allocation9], 4294964224  ;;  %v950_v0 = vmov 0.0   ;;  %vm951_vm0 = vmmov 0   ;;  %v751_v1 = vld [vmem:[#allocation5] sm:$0xff]   ;;  %v752_v2 = vld [vmem:[#allocation5 + $0x8] sm:$0xff]   ;;  %v189_v52 = vlaneseq }
  0x5b   :  { %710 = vmatprep.subr.bf16.mxu0 %v950_v0  ;;  %714 = vmatprep.mubr.msk.bf16.mxu0 %vm951_vm0, %v950_v0  ;;  %v100_v3 = vld [vmem:[#allocation2] sm:$0xff]  ;;  %v756_v6 = vld [vmem:[#allocation7 + $0x14] ss:$8 sps:$4 sm:$0xff]   ;;  %vm125_vm1 = vcmask 261120   ;;  %v758_v8 = vld [vmem:[#allocation7 + $0x10] ss:$8 sps:$4 sm:$0xff]  }
  0x5c   :  { %711 = vmatpush3.bf16.msra.mxu0 %v751_v1  ;;  %v753_v4 = vld [vmem:[#allocation7 + $0x4] ss:$8 sps:$4 sm:$0xff]   ;;  %v755_v5 = vld [vmem:[#allocation7] ss:$8 sps:$4 sm:$0xff]   ;;  %v101_v7 = vpack.c.bf16 %v100_v3, %v100_v3  ;;  %v762_v11 = vld [vmem:[#allocation7 + $0x34] ss:$8 sps:$4 sm:$0xff]  }
  0x5d   :  { %712 = vmatprep.subr.bf16.mxu0 %v950_v0  ;;  %279 = vmatprep.subr.bf16.mxu1 %v753_v4  ;;  %v759_v9 = vld [vmem:[#allocation7 + $0x24] ss:$8 sps:$4 sm:$0xff]   ;;  %v761_v10 = vld [vmem:[#allocation7 + $0x20] ss:$8 sps:$4 sm:$0xff]   ;;  %v764_v12 = vld [vmem:[#allocation7 + $0x30] ss:$8 sps:$4 sm:$0xff]  }
  0x5e   :  { %280 = vmatpush1.bf16.msra.mxu1 %v755_v5  ;;  %v765_v13 = vld [vmem:[#allocation7 + $0x44] ss:$8 sps:$4 sm:$0xff]   ;;  %v767_v14 = vld [vmem:[#allocation7 + $0x40] ss:$8 sps:$4 sm:$0xff]   ;;  %v768_v15 = vld [vmem:[#allocation7 + $0x54] ss:$8 sps:$4 sm:$0xff]  }
  0x5f   :  { %281 = vmatprep.subr.bf16.mxu1 %v756_v6  ;;  %v770_v16 = vld [vmem:[#allocation7 + $0x50] ss:$8 sps:$4 sm:$0xff]   ;;  %v771_v17 = vld [vmem:[#allocation7 + $0x64] ss:$8 sps:$4 sm:$0xff]   ;;  %v773_v18 = vld [vmem:[#allocation7 + $0x60] ss:$8 sps:$4 sm:$0xff]  }
  0x60   :  { %713 = vmatpush3.bf16.msra.mxu0 %v752_v2  ;;  %v774_v19 = vld [vmem:[#allocation7 + $0x74] ss:$8 sps:$4 sm:$0xff]   ;;  %v776_v20 = vld [vmem:[#allocation7 + $0x70] ss:$8 sps:$4 sm:$0xff]   ;;  %v952_v21 = vmov 0   ;;  %v777_v22 = vld [vmem:[#allocation8 + $0x40] sm:$0xff]  }
  0x61   :  { %311 = vmatprep.mubr.bf16.mxu1 %v952_v21  ;;  %v778_v23 = vld [vmem:[#allocation8] sm:$0xff]   ;;  %v779_v24 = vld [vmem:[#allocation8 + $0x48] sm:$0xff]   ;;  %679 = vmatprep.subr.bf16.mxu0 %v777_v22  ;;  %v781_v26 = vld [vmem:[#allocation8 + $0x50] sm:$0xff]   ;;  %v190_v53 = vshrl.u32 %v189_v52, 7  ;;  %s953_s13 = smov [#allocation11]  }
  0x62   :  { %282 = vmatpush1.bf16.msra.mxu1 %v758_v8  ;;  %v780_v25 = vld [vmem:[#allocation8 + $0x8] sm:$0xff]   ;;  %v782_v27 = vld [vmem:[#allocation8 + $0x10] sm:$0xff]   ;;  %v783_v28 = vld [vmem:[#allocation8 + $0x58] sm:$0xff]   ;;  %s619_s1 = sshll.u32 %s953_s13, 4  ;;  %s620_s1 = int_to_ptr.vmem [resolvable:$true] %s619_s1 }
  0x63   :  { %715 = vmatmul.mubr.msk.bf16.vlgmr.msra.gmra.mrb[0].mxu0 %vm125_vm1, %v101_v7  ;;  %283 = vmatprep.subr.bf16.mxu1 %v759_v9  ;;  %v784_v29 = vld [vmem:[#allocation8 + $0x18] sm:$0xff]   ;;  %v785_v30 = vld [vmem:[#allocation8 + $0x60] sm:$0xff]   ;;  %v787_v32 = vld [vmem:[#allocation8 + $0x68] sm:$0xff]   ;;  %v191_v54 = vsub.s32 0, %v190_v53  ;;  %v195_v56 = vsub.s32 1, %v190_v53  ;;  %p916_p13 = scmp.lt.s32.totalorder %s620_s1, %s620_s1 }
  0x64   :  { %680 = vmatpush3.bf16.msra.mxu0 %v778_v23  ;;  %v786_v31 = vld [vmem:[#allocation8 + $0x20] sm:$0xff]   ;;  %v788_v33 = vld [vmem:[#allocation8 + $0x28] sm:$0xff]   ;;  %v789_v42 = vld [vmem:[#allocation8 + $0x70] sm:$0xff]  }
  0x65   :  { %681 = vmatprep.subr.bf16.mxu0 %v779_v24  ;;  %v630_v34 = vld [vmem:[%s1113_s2] ss:$0 sm:$0xff]  ;;  %v790_v43 = vld [vmem:[#allocation8 + $0x30] sm:$0xff]   ;;  %v791_v44 = vld [vmem:[#allocation8 + $0x78] sm:$0xff]  }
  0x66   :  { %284 = vmatpush1.bf16.msra.mxu1 %v761_v10  ;;  %v792_v45 = vld [vmem:[#allocation8 + $0x38] sm:$0xff]   ;;  %v793_v46 = vld [vmem:[#allocation10] sm:$0xff]   ;;  %v794_v47 = vld [vmem:[#allocation10 + $0x8] sm:$0xff]  }
  0x67   :  { %285 = vmatprep.subr.bf16.mxu1 %v762_v11  ;;  %v795_v48 = vld [vmem:[#allocation10 + $0x10] sm:$0xff]   ;;  %v796_v49 = vld [vmem:[#allocation10 + $0x18] sm:$0xff]   ;;  %v797_v50 = vld [vmem:[#allocation10 + $0x20] sm:$0xff]  }
  0x68   :  { %682 = vmatpush3.bf16.msra.mxu0 %v780_v25  ;;  %v798_v51 = vld [vmem:[#allocation10 + $0x28] sm:$0xff]   ;;  %v799_v6 = vld [vmem:[#allocation10 + $0x30] sm:$0xff]   ;;  %v800_v7 = vld [vmem:[#allocation10 + $0x38] sm:$0xff]  }
  0x69   :  { %683 = vmatprep.subr.bf16.mxu0 %v781_v26  ;;  %v187_v55 = vld [vmem:[%s1115_s4] sm:$0x3] }
  0x6a   :  { %286 = vmatpush1.bf16.msra.mxu1 %v764_v12  ;;  %v192_v57 = vrot.slane %v187_v55, %v191_v54  ;;  %v196_v58 = vrot.slane %v187_v55, %v195_v56  ;;  %v650_v9 = vld [vmem:[%s1117_s6] ss:$0 sm:$0xff]  ;;  %s911_s6 = scalar_lea.vmem %s620_s1, 128 }
  0x6b   :  { %287 = vmatprep.subr.bf16.mxu1 %v765_v13  ;;  %p912_p12 = scmp.ne.s32.totalorder %s620_s1, %s911_s6  ;;  %p917_p0 = scmp.lt.s32.totalorder %s911_s6, %s911_s6 }
  0x6c   :  { %684 = vmatpush3.bf16.msra.mxu0 %v782_v27 }
  0x6d   :  { %685 = vmatprep.subr.bf16.mxu0 %v783_v28  ;;  %p918_p1 = por %p917_p0, %p916_p13 }
  0x6e   :  { %288 = vmatpush1.bf16.msra.mxu1 %v767_v14 }
  0x6f   :  { %289 = vmatprep.subr.bf16.mxu1 %v768_v15  ;;  %p919_p2 = pnand %p918_p1, %p912_p12 }
  0x70   :  { %686 = vmatpush3.bf16.msra.mxu0 %v784_v29 }
  0x71   :  { %687 = vmatprep.subr.bf16.mxu0 %v785_v30 }
  0x72   :  { %290 = vmatpush1.bf16.msra.mxu1 %v770_v16 }
  0x73   :  { %291 = vmatprep.subr.bf16.mxu1 %v771_v17  ;;  %v667_v17 = vld [vmem:[%s1119_s8] ss:$0 sm:$0xff] }
  0x74   :  { %688 = vmatpush3.bf16.msra.mxu0 %v786_v31 }
  0x75   :  { %689 = vmatprep.subr.bf16.mxu0 %v787_v32 }
  0x76   :  { %292 = vmatpush1.bf16.msra.mxu1 %v773_v18 }
  0x77   :  { %293 = vmatprep.subr.bf16.mxu1 %v774_v19 }
  0x78   :  { %690 = vmatpush3.bf16.msra.mxu0 %v788_v33 }
  0x79   :  { %691 = vmatprep.subr.bf16.mxu0 %v789_v42 }
  0x7a   :  { %294 = vmatpush1.bf16.msra.mxu1 %v776_v20 }
  0x7b   :  { %718 = vmatprep.subr.bf16.mxu1 %v950_v0 }
  0x7c   :  { %692 = vmatpush3.bf16.msra.mxu0 %v790_v43 }
  0x7d   :  { %693 = vmatprep.subr.bf16.mxu0 %v791_v44 }
  0x80   :  { %694 = vmatpush3.bf16.msra.mxu0 %v792_v45 }
 0x136   :  { %v163_v35 = vpop.f32.mrb[0].mxu0 }
 0x137   :  { %v164_v36 = vadd.f32 %v630_v34, %v163_v35  ;;  %v716_v37 = vpop.f32.mrb[1].mxu0 }
 0x138   :  { %v166_v38 = vpop.f32.mrb[2].mxu0 }
 0x139   :  { %v169_v39 = vmax.f32 %v164_v36, 0.0  ;;  %v717_v40 = vpop.f32.mrb[3].mxu0 }
 0x13b   :  { %v170_v41 = vpack.c.bf16 %v169_v39, %v169_v39 }
 0x13d   :  { %312 = vmatmul.mubr.bf16.vlgmr.msra.gmra.mrb[0].mxu1 %v170_v41 }
 0x13e   :  { %734 = vmatprep.mubr.msk.bf16.mxu1 %vm951_vm0, %v950_v0  ;;  %719 = vmatpush3.bf16.msra.mxu1 %v793_v46 }
 0x13f   :  { %720 = vmatprep.subr.bf16.mxu1 %v950_v0 }
 0x142   :  { %721 = vmatpush3.bf16.msra.mxu1 %v794_v47 }
 0x143   :  { %722 = vmatprep.subr.bf16.mxu1 %v950_v0 }
 0x146   :  { %723 = vmatpush3.bf16.msra.mxu1 %v795_v48 }
 0x147   :  { %724 = vmatprep.subr.bf16.mxu1 %v950_v0 }
 0x14a   :  { %725 = vmatpush3.bf16.msra.mxu1 %v796_v49 }
 0x14b   :  { %726 = vmatprep.subr.bf16.mxu1 %v950_v0 }
 0x14e   :  { %727 = vmatpush3.bf16.msra.mxu1 %v797_v50 }
 0x14f   :  { %728 = vmatprep.subr.bf16.mxu1 %v950_v0 }
 0x152   :  { %729 = vmatpush3.bf16.msra.mxu1 %v798_v51 }
 0x153   :  { %730 = vmatprep.subr.bf16.mxu1 %v950_v0 }
 0x156   :  { %731 = vmatpush3.bf16.msra.mxu1 %v799_v6 }
 0x157   :  { %732 = vmatprep.subr.bf16.mxu1 %v950_v0 }
 0x15a   :  { %733 = vmatpush3.bf16.msra.mxu1 %v800_v7 }
 0x210   :  { %v313_v59 = vpop.f32.mrb[0].mxu1 }
 0x211   :  { %v314_v60 = vadd.f32 %v313_v59, %v192_v57  ;;  %v315_v61 = vpop.f32.mrb[1].mxu1 }
 0x212   :  { %v316_v62 = vadd.f32 %v315_v61, %v196_v58  ;;  %v317_v63 = vpop.f32.mrb[2].mxu1 }
 0x213   :  { %v320_v1 = vmax.f32 %v314_v60, 0.0  ;;  %v318_v2 = vpop.f32.mrb[3].mxu1 }
 0x214   :  { %v321_v3 = vmax.f32 %v316_v62, 0.0 }
 0x215   :  { %v322_v5 = vpack.c.bf16 %v320_v1, %v320_v1 }
 0x216   :  { %v323_v4 = vpack.c.bf16 %v321_v3, %v321_v3 }
 0x218   :  { %491 = vmatprep.mubr.bf16.mxu0 %v323_v4 }
 0x219   :  { %492 = vmatmul.mubr.bf16.vlgmr.msra.gmra.mrb[4].mxu0 %v322_v5 }
 0x2ec   :  { %v695_v8 = vpop.f32.mrb[4].mxu0 }
 0x2ed   :  { %v696_v10 = vpop.f32.mrb[5].mxu0 }
 0x2ee   :  { %v697_v11 = vadd.f32 %v696_v10, %v695_v8  ;;  %v698_v12 = vpop.f32.mrb[6].mxu0 }
 0x2ef   :  { %v699_v13 = vpop.f32.mrb[7].mxu0 }
 0x2f0   :  { %v494_v14 = vadd.f32 %v697_v11, %v650_v9 }
 0x2f2   :  { %v499_v15 = vmax.f32 %v494_v14, 0.0 }
 0x2f4   :  { %v500_v16 = vpack.c.bf16 %v499_v15, %v499_v15 }
 0x2f6   :  { %735 = vmatmul.mubr.bf16.vlgmr.msra.gmra.mrb[4].mxu1 %v500_v16 }
 0x3c9   :  { %v606_v0 = vpop.f32.mrb[4].mxu1 }
 0x3ca   :  { %v607_v18 = vadd.f32 %v667_v17, %v606_v0  ;;  %v736_v19 = vpop.f32.mrb[5].mxu1 }
 0x3cb   :  { %v609_v20 = vpop.f32.mrb[6].mxu1 }
 0x3cc   :  { %612 = vst [vmem:[#allocation11] sm:$0xff] %v607_v18  ;;  %v737_v21 = vpop.f32.mrb[7].mxu1 }
 0x3cd   :  { %922 = shalt.err (!%p919_p2)
}
 0x3ce   :  { %s923_s8 = scalar_lea.hbm %s1120_s9, 128 }
 0x3cf   :  { %p924_p3 = scmp.ne.s32.totalorder %s1120_s9, %s923_s8  ;;  %p927_p4 = scmp.lt.u32.totalorder %s923_s8, %s1120_s9 }
 0x3d1   :  { %p929_p5 = pnand %p927_p4, %p924_p3 }
 0x3d3   :  { %932 = shalt.err (!%p929_p5)
}
 0x3d4   :  { %622 = dma.vmem_to_hbm [thread:$0]  %s620_s1, 128, %s1120_s9, [#allocation4]  }
 0x3d5   :  { %939 = dma.done.wait [#allocation4], 128  }
 0x3d6   :  { %940 = vsyncadd [#allocation4], 4294967168 }
 0x3d7   :  { %626 = vsyncpa [#allocation3], 1 }
 0x3d8   :  { %627 = vsyncpa [#allocation6], 1 }
 0x3d9   :  { %628 = vsyncpa [#allocation9], 1 }
 0x3da   :  { %629 = vsyncpa [#allocation4], 1 }

</bundles_post_ra>
